<compile_context>
chip_gen: v6e
topology: v6e:2x2x1
jax: 0.10.0
libtpu: 0.0.40
codegen_flags: <defaults>
</compile_context>

<pallas_src>
import functools

import jax
import jax.numpy as jnp
from jax import lax
from jax.experimental import pallas as pl
from jax.experimental.pallas import tpu as pltpu

_NEG = -1e30  # fill value for masked logits (diagonal self-sim / padded columns)


def _round_up(x: int, m: int) -> int:
    return ((x + m - 1) // m) * m


def _infonce_kernel(q_ref, k_ref, out_ref, m_scr, l_scr, pos_scr, *,
                    n: int, half: int, padded: bool):
    """One (row_block, col_block) tile of the 2B x 2B similarity matrix."""
    i = pl.program_id(0)                 # row-block index ("parallel")
    j = pl.program_id(1)                 # col-block index ("arbitrary", reduction, last)
    bm = q_ref.shape[0]
    bn = k_ref.shape[0]

    # ---- reset per-row-block online-softmax state at the first column step ----
    @pl.when(j == 0)
    def _init():
        m_scr[...] = jnp.full_like(m_scr, -jnp.inf)   # running max
        l_scr[...] = jnp.zeros_like(l_scr)            # running sum of exp
        pos_scr[...] = jnp.zeros_like(pos_scr)        # positive-pair logit

    # ---- scores: contract the feature axis of BOTH operands (no transpose) ----
    # q is pre-normalized and pre-scaled by 1/temperature, k is pre-normalized,
    # so the matmul is the only heavy per-step work.
    s = lax.dot_general(q_ref[...], k_ref[...], (((1,), (1,)), ((), ())),
                        preferred_element_type=jnp.float32)          # (bm, bn) f32

    # Global row / column indices, kept 1-D and broadcast inside the compares
    # (no (bm, bn) int32 tensors materialized).
    r = i * bm + lax.broadcasted_iota(jnp.int32, (bm, 1), 0)          # (bm, 1)
    c = j * bn + lax.broadcasted_iota(jnp.int32, (1, bn), 1)          # (1, bn)

    # ---- diagonal (self-sim) + padded-column kill mask: ONE fused select ----
    # (2-3 VPU ops per tile; cheap enough to leave ungated.)
    kill = r == c
    if padded:
        kill = kill | (c >= n)
    s = jnp.where(kill, jnp.float32(_NEG), s)

    # ---- positive pair: col == row ± half.  Gate the per-element work to the
    # few tiles whose column range intersects one of the two bands. ----
    row_lo, row_hi = i * bm, i * bm + bm
    col_lo, col_hi = j * bn, j * bn + bn
    hit_p = (row_lo + half < col_hi) & (col_lo < row_hi + half)
    hit_m = (row_lo - half < col_hi) & (col_lo < row_hi - half)

    @pl.when(hit_p | hit_m)
    def _pos():
        pm = (c == r + half) | (c == r - half)
        if padded:
            pm = pm & (c < n)    # a padded row's wrap-around must not pick a padded col
        pos_scr[...] += jnp.sum(jnp.where(pm, s, 0.0), axis=-1, keepdims=True)

    # ---- online logsumexp across column blocks ----
    m_prev = m_scr[...]
    m_new = jnp.maximum(m_prev, jnp.max(s, axis=-1, keepdims=True))
    alpha = jnp.exp(m_prev - m_new)
    l_scr[...] = l_scr[...] * alpha + jnp.sum(jnp.exp(s - m_new), axis=-1, keepdims=True)
    m_scr[...] = m_new

    # ---- finalize: per-row NLL, written once at the last column step ----
    @pl.when(j == pl.num_programs(1) - 1)
    def _finalize():
        nll = (m_scr[...] + jnp.log(l_scr[...])) - pos_scr[...]      # (bm, 1)
        if padded:
            rr = i * bm + lax.broadcasted_iota(jnp.int32, (bm, 1), 0)
            nll = jnp.where(rr < n, nll, 0.0)                        # drop padded rows
        out_ref[...] = nll


def _select_tiles(n, f, dtype_bytes, bm_req, bn_req, vmem_budget):
    """Pick rectangular (row, col) tile sizes and the padded N."""
    # 128-lane multiples for production sizes; dtype sublane packing (8 f32 /
    # 16 bf16 / 32 int8) as the floor for tiny N (block == full dim).
    sub = {4: 8, 2: 16, 1: 32}.get(dtype_bytes, 8)
    gran = 128 if n >= 128 else sub

    bn = max(gran, min(_round_up(bn_req, gran), _round_up(n, gran)))
    bm = max(bn, (max(bm_req, bn) // bn) * bn)        # bm is a multiple of bn
    bm = min(bm, _round_up(n, bn))

    def footprint(bm_, bn_):
        return (2 * bm_ * f * dtype_bytes             # resident row block (double-buffered)
                + 3 * bn_ * f * dtype_bytes           # streamed col block (<=3 buffers)
                + 4 * bm_ * bn_ * 4                   # live f32 (bm,bn) intermediates
                + 5 * bm_ * 128 * 4)                  # (bm,1) stats/out, lane-padded

    # Keep the VMEM footprint inside the budget (v7x: 64 MiB physical VMEM).
    while bm > bn and footprint(bm, bn) > vmem_budget:
        bm -= bn                                      # keeps bm % bn == 0
    # Keep >=2 row blocks when possible so the "parallel" axis can use both
    # v7x TensorCores (megacore).
    while bm > bn and _round_up(n, bm) // bm < 2:
        bm -= bn

    n_pad = _round_up(n, bm)                          # also a multiple of bn
    return bm, bn, n_pad


def infonce_loss(z1: jax.Array, z2: jax.Array, temperature: float = 0.1, *,
                 block_rows: int = 512, block_cols: int = 256,
                 vmem_budget_bytes: int = 40 * 1024 * 1024) -> jax.Array:
    """InfoNCE loss. z1, z2: (batch, n_features). Returns a scalar float32.

    block_rows / block_cols: requested tile edges; v6e can profitably raise
    block_rows to 1024 for large batches, v5e is already MXU-bound at 256.
    """
    assert z1.ndim == 2 and z1.shape == z2.shape
    b, f = z1.shape
    n = 2 * b
    half = n // 2
    inv_temp = float(1.0 / temperature)

    feats = jnp.concatenate([z1, z2], axis=0)
    dt = feats.dtype
    dtype_bytes = jnp.dtype(dt).itemsize

    # Hoisted L2 normalization: one f32 elementwise pass over (N, F); the
    # 1/temperature scale is folded into the ROW operand only.
    # (Per-vector clamp rsqrt(max(||x||^2, 1e-16)) vs the reference's joint
    #  clamp max(||x||*||y||, 1e-8): identical for non-degenerate embeddings.)
    ff = feats.astype(jnp.float32)
    inv_norm = lax.rsqrt(jnp.maximum(jnp.sum(ff * ff, axis=-1, keepdims=True), 1e-16))
    k_arr = (ff * inv_norm).astype(dt)                     # column operand
    q_arr = (ff * (inv_norm * inv_temp)).astype(dt)        # row operand (temp folded in)

    # Lane-align the feature (contraction) axis when it is large but unaligned.
    if f >= 128 and f % 128 != 0:
        f_pad = _round_up(f, 128)
        q_arr = jnp.pad(q_arr, ((0, 0), (0, f_pad - f)))
        k_arr = jnp.pad(k_arr, ((0, 0), (0, f_pad - f)))
        f = f_pad

    bm, bn, n_pad = _select_tiles(n, f, dtype_bytes, block_rows, block_cols,
                                  vmem_budget_bytes)
    if n_pad != n:
        q_arr = jnp.pad(q_arr, ((0, n_pad - n), (0, 0)))
        k_arr = jnp.pad(k_arr, ((0, n_pad - n), (0, 0)))
    padded = n_pad != n
    grid = (n_pad // bm, n_pad // bn)

    kernel = functools.partial(_infonce_kernel, n=n, half=half, padded=padded)

    # Streamed column operand: deeper buffering when F is small (per-step
    # compute too short to hide DMA issue latency at the default depth of 2).
    col_spec = pl.BlockSpec((bn, f), lambda i, j: (j, 0))
    n_kbufs = 2
    if f <= 256 and grid[1] >= 2:
        try:
            col_spec = pl.BlockSpec((bn, f), lambda i, j: (j, 0),
                                    pipeline_mode=pl.Buffered(3))
            n_kbufs = 3
        except (TypeError, AttributeError):
            pass  # older BlockSpec without pipeline_mode; keep default depth 2

    # VMEM limit from the actual footprint (+headroom), never the full physical
    # VMEM (v7x only has 64 MiB).
    est = ((2 * bm + n_kbufs * bn) * f * dtype_bytes
           + 4 * bm * bn * 4 + 5 * bm * 128 * 4)
    vmem_limit = max(32 * 1024 * 1024,
                     min(int(est * 1.25) + (2 << 20), 56 * 1024 * 1024))

    nll = pl.pallas_call(
        kernel,
        out_shape=jax.ShapeDtypeStruct((n_pad, 1), jnp.float32),
        grid_spec=pltpu.PrefetchScalarGridSpec(
            num_scalar_prefetch=0,
            grid=grid,
            in_specs=[
                pl.BlockSpec((bm, f), lambda i, j: (i, 0)),   # row block: resident across j
                col_spec,                                     # col block: streamed per step
            ],
            out_specs=pl.BlockSpec((bm, 1), lambda i, j: (i, 0)),
            scratch_shapes=[pltpu.VMEM((bm, 1), jnp.float32),   # running max
                            pltpu.VMEM((bm, 1), jnp.float32),   # running sum-exp
                            pltpu.VMEM((bm, 1), jnp.float32)],  # positive logit
        ),
        compiler_params=pltpu.CompilerParams(
            dimension_semantics=("parallel", "arbitrary"),
            vmem_limit_bytes=vmem_limit),
    )(q_arr, k_arr)

    return jnp.sum(nll) / jnp.float32(n)


def _infonce_ref(z1, z2, temperature=0.1):
    # pure-JAX reference mirroring the PyTorch forward
    feats = jnp.concatenate([z1, z2], axis=0).astype(jnp.float32)
    n = feats.shape[0]
    norm = jnp.linalg.norm(feats, axis=-1, keepdims=True)
    cos = (feats @ feats.T) / jnp.maximum(norm * norm.T, 1e-8)
    eye = jnp.eye(n, dtype=bool)
    cos = jnp.where(eye, -9e15, cos) / temperature
    pos_mask = jnp.roll(eye, shift=n // 2, axis=0)
    pos = jnp.sum(jnp.where(pos_mask, cos, 0.0), axis=-1)
    lse = jax.scipy.special.logsumexp(cos, axis=-1)
    return jnp.mean(-pos + lse)


if __name__ == "__main__":
    key = jax.random.PRNGKey(0)
    k1, k2, k3, k4 = jax.random.split(key, 4)

    # 1) single-tile path (batch=8 -> N=16, F=32), f32, default tiles.
    z1 = jax.random.normal(k1, (8, 32), dtype=jnp.float32)
    z2 = jax.random.normal(k2, (8, 32), dtype=jnp.float32)
    ref = jax.block_until_ready(_infonce_ref(z1, z2, 0.1))
    out = jax.block_until_ready(infonce_loss(z1, z2, 0.1))
    assert jnp.allclose(out, ref, rtol=2e-4, atol=2e-4), (out, ref)

    # 2) multi-tile 2x2 grid: exercises online LSE, gated positive bands and
    #    the Buffered(3) column stream.
    out2 = jax.block_until_ready(infonce_loss(z1, z2, 0.1, block_rows=8, block_cols=8))
    assert jnp.allclose(out2, ref, rtol=2e-4, atol=2e-4), (out2, ref)

    # 3) padded rows/cols (batch=5 -> N=10 padded to 16) on a 2x2 grid.
    z1b = jax.random.normal(k3, (5, 32), dtype=jnp.float32)
    z2b = jax.random.normal(k4, (5, 32), dtype=jnp.float32)
    ref3 = jax.block_until_ready(_infonce_ref(z1b, z2b, 0.2))
    out3 = jax.block_until_ready(infonce_loss(z1b, z2b, 0.2, block_rows=8, block_cols=8))
    assert jnp.allclose(out3, ref3, rtol=2e-4, atol=2e-4), (out3, ref3)

    # 4) bf16 inputs (bf16 MXU path, 16-sublane row-block granularity).
    z1h = z1.astype(jnp.bfloat16)
    z2h = z2.astype(jnp.bfloat16)
    ref4 = jax.block_until_ready(_infonce_ref(z1h, z2h, 0.1))
    out4 = jax.block_until_ready(infonce_loss(z1h, z2h, 0.1))
    assert jnp.allclose(out4, ref4, rtol=1e-1, atol=1e-1), (out4, ref4)

    # 5) 128-multiple production-style tiles: batch=256, F=128 -> N=512,
    #    256x256 blocks on a 2x2 grid (>=2 parallel row blocks for megacore).
    z1c = jax.random.normal(k1, (256, 128), dtype=jnp.float32)
    z2c = jax.random.normal(k2, (256, 128), dtype=jnp.float32)
    ref5 = jax.block_until_ready(_infonce_ref(z1c, z2c, 0.1))
    out5 = jax.block_until_ready(infonce_loss(z1c, z2c, 0.1))
    assert jnp.allclose(out5, ref5, rtol=2e-4, atol=2e-4), (out5, ref5)

    print("KERNEL_OK")
</pallas_src>

<mosaic_0001>
module attributes {stable_mosaic.version = 11 : i64} {
  func.func @_infonce_kernel(%arg0: i32, %arg1: i32, %arg2: memref<16x32xf32, #tpu.memory_space<vmem>>, %arg3: memref<16x32xf32, #tpu.memory_space<vmem>>, %arg4: memref<16x1xf32, #tpu.memory_space<vmem>>, %arg5: memref<16x1xf32, #tpu.memory_space<vmem>>, %arg6: memref<16x1xf32, #tpu.memory_space<vmem>>, %arg7: memref<16x1xf32, #tpu.memory_space<vmem>>) attributes {dimension_semantics = [#tpu.dimension_semantics<parallel>, #tpu.dimension_semantics<arbitrary>], iteration_bounds = array<i64: 1, 1>, scalar_prefetch = 0 : i64, scratch_operands = 3 : i64, tpu.core_type = #tpu.core_type<tc>, window_params = [{transform_indices = @transform_0, window_bounds = array<i64: 16, 32>}, {transform_indices = @transform_1, window_bounds = array<i64: 16, 32>}, {transform_indices = @transform_2, window_bounds = array<i64: 16, 1>}]} {
    %c0_i32 = arith.constant 0 : i32
    %0 = arith.cmpi eq, %arg1, %c0_i32 : i32
    %1 = arith.extui %0 : i1 to i32
    %c0_i32_0 = arith.constant 0 : i32
    %2 = arith.cmpi ne, %1, %c0_i32_0 : i32
    scf.if %2 {
      %cst_28 = arith.constant 0xFF800000 : f32
      %57 = vector.broadcast %cst_28 : f32 to vector<16x1xf32>
      %c0_29 = arith.constant 0 : index
      %c0_30 = arith.constant 0 : index
      %58 = vector.load %arg5[%c0_29, %c0_30] : memref<16x1xf32, #tpu.memory_space<vmem>>, vector<16x1xf32>
      tpu.vector_store %arg5[%c0_29, %c0_30], %57 {strides = array<i32>} : memref<16x1xf32, #tpu.memory_space<vmem>>, vector<16x1xf32>,
      %cst_31 = arith.constant 0.000000e+00 : f32
      %59 = vector.broadcast %cst_31 : f32 to vector<16x1xf32>
      %c0_32 = arith.constant 0 : index
      %c0_33 = arith.constant 0 : index
      %60 = vector.load %arg6[%c0_32, %c0_33] : memref<16x1xf32, #tpu.memory_space<vmem>>, vector<16x1xf32>
      tpu.vector_store %arg6[%c0_32, %c0_33], %59 {strides = array<i32>} : memref<16x1xf32, #tpu.memory_space<vmem>>, vector<16x1xf32>,
      %cst_34 = arith.constant 0.000000e+00 : f32
      %61 = vector.broadcast %cst_34 : f32 to vector<16x1xf32>
      %c0_35 = arith.constant 0 : index
      %c0_36 = arith.constant 0 : index
      %62 = vector.load %arg7[%c0_35, %c0_36] : memref<16x1xf32, #tpu.memory_space<vmem>>, vector<16x1xf32>
      tpu.vector_store %arg7[%c0_35, %c0_36], %61 {strides = array<i32>} : memref<16x1xf32, #tpu.memory_space<vmem>>, vector<16x1xf32>,
    } else {
    }
    %c0 = arith.constant 0 : index
    %c0_1 = arith.constant 0 : index
    %3 = vector.load %arg2[%c0, %c0_1] : memref<16x32xf32, #tpu.memory_space<vmem>>, vector<16x32xf32>
    %c0_2 = arith.constant 0 : index
    %c0_3 = arith.constant 0 : index
    %4 = vector.load %arg3[%c0_2, %c0_3] : memref<16x32xf32, #tpu.memory_space<vmem>>, vector<16x32xf32>
    %cst = arith.constant dense<0.000000e+00> : vector<16x16xf32>
    %5 = tpu.matmul %3, %4, %cst {dimension_numbers = #tpu.dot_dimension_numbers<[1], [1], [0], [0], [0, 0, 1, 0], [], []>} : vector<16x32xf32>, vector<16x32xf32>, vector<16x16xf32> -> vector<16x16xf32>
    %c16_i32 = arith.constant 16 : i32
    %6 = arith.muli %arg0, %c16_i32 : i32
    %7 = tpu.iota {dimensions = array<i32: 0>} : vector<16x1xi32>
    %8 = vector.broadcast %6 : i32 to vector<16x1xi32>
    %9 = arith.addi %8, %7 : vector<16x1xi32>
    %c16_i32_4 = arith.constant 16 : i32
    %10 = arith.muli %arg1, %c16_i32_4 : i32
    %11 = tpu.iota {dimensions = array<i32: 1>} : vector<1x16xi32>
    %12 = vector.broadcast %10 : i32 to vector<1x16xi32>
    %13 = arith.addi %12, %11 : vector<1x16xi32>
    %14 = vector.broadcast %9 : vector<16x1xi32> to vector<16x16xi32>
    %15 = vector.broadcast %13 : vector<1x16xi32> to vector<16x16xi32>
    %16 = arith.cmpi eq, %14, %15 : vector<16x16xi32>
    %cst_5 = arith.constant -1.000000e+30 : f32
    %17 = vector.broadcast %cst_5 : f32 to vector<16x16xf32>
    %18 = arith.select %16, %17, %5 : vector<16x16xi1>, vector<16x16xf32>
    %c16_i32_6 = arith.constant 16 : i32
    %19 = arith.muli %arg0, %c16_i32_6 : i32
    %c16_i32_7 = arith.constant 16 : i32
    %20 = arith.muli %arg0, %c16_i32_7 : i32
    %c16_i32_8 = arith.constant 16 : i32
    %21 = arith.addi %20, %c16_i32_8 : i32
    %c16_i32_9 = arith.constant 16 : i32
    %22 = arith.muli %arg1, %c16_i32_9 : i32
    %c16_i32_10 = arith.constant 16 : i32
    %23 = arith.muli %arg1, %c16_i32_10 : i32
    %c16_i32_11 = arith.constant 16 : i32
    %24 = arith.addi %23, %c16_i32_11 : i32
    %c8_i32 = arith.constant 8 : i32
    %25 = arith.addi %19, %c8_i32 : i32
    %26 = arith.cmpi slt, %25, %24 : i32
    %c8_i32_12 = arith.constant 8 : i32
    %27 = arith.addi %21, %c8_i32_12 : i32
    %28 = arith.cmpi slt, %22, %27 : i32
    %29 = arith.andi %26, %28 : i1
    %c8_i32_13 = arith.constant 8 : i32
    %30 = arith.subi %19, %c8_i32_13 : i32
    %31 = arith.cmpi slt, %30, %24 : i32
    %c8_i32_14 = arith.constant 8 : i32
    %32 = arith.subi %21, %c8_i32_14 : i32
    %33 = arith.cmpi slt, %22, %32 : i32
    %34 = arith.andi %31, %33 : i1
    %35 = arith.ori %29, %34 : i1
    %36 = arith.extui %35 : i1 to i32
    %c0_i32_15 = arith.constant 0 : i32
    %37 = arith.cmpi ne, %36, %c0_i32_15 : i32
    scf.if %37 {
      %c8_i32_28 = arith.constant 8 : i32
      %57 = vector.broadcast %c8_i32_28 : i32 to vector<16x1xi32>
      %58 = arith.addi %9, %57 : vector<16x1xi32>
      %59 = vector.broadcast %13 : vector<1x16xi32> to vector<16x16xi32>
      %60 = vector.broadcast %58 : vector<16x1xi32> to vector<16x16xi32>
      %61 = arith.cmpi eq, %59, %60 : vector<16x16xi32>
      %c8_i32_29 = arith.constant 8 : i32
      %62 = vector.broadcast %c8_i32_29 : i32 to vector<16x1xi32>
      %63 = arith.subi %9, %62 : vector<16x1xi32>
      %64 = vector.broadcast %13 : vector<1x16xi32> to vector<16x16xi32>
      %65 = vector.broadcast %63 : vector<16x1xi32> to vector<16x16xi32>
      %66 = arith.cmpi eq, %64, %65 : vector<16x16xi32>
      %67 = arith.ori %61, %66 : vector<16x16xi1>
      %c0_30 = arith.constant 0 : index
      %c0_31 = arith.constant 0 : index
      %68 = vector.load %arg7[%c0_30, %c0_31] : memref<16x1xf32, #tpu.memory_space<vmem>>, vector<16x1xf32>
      %cst_32 = arith.constant 0.000000e+00 : f32
      %69 = vector.broadcast %cst_32 : f32 to vector<16x16xf32>
      %70 = arith.select %67, %18, %69 : vector<16x16xi1>, vector<16x16xf32>
      %cst_33 = arith.constant dense<0.000000e+00> : vector<16xf32>
      %71 = vector.multi_reduction <add>, %70, %cst_33 [1] : vector<16x16xf32> to vector<16xf32>
      %72 = vector.shape_cast %71 : vector<16xf32> to vector<16x1xf32>
      %73 = arith.addf %68, %72 : vector<16x1xf32>
      %c0_34 = arith.constant 0 : index
      %c0_35 = arith.constant 0 : index
      %74 = vector.load %arg7[%c0_34, %c0_35] : memref<16x1xf32, #tpu.memory_space<vmem>>, vector<16x1xf32>
      tpu.vector_store %arg7[%c0_34, %c0_35], %73 {strides = array<i32>} : memref<16x1xf32, #tpu.memory_space<vmem>>, vector<16x1xf32>,
    } else {
    }
    %c0_16 = arith.constant 0 : index
    %c0_17 = arith.constant 0 : index
    %38 = vector.load %arg5[%c0_16, %c0_17] : memref<16x1xf32, #tpu.memory_space<vmem>>, vector<16x1xf32>
    %cst_18 = arith.constant dense<0xFF800000> : vector<16xf32>
    %39 = vector.multi_reduction <maximumf>, %18, %cst_18 [1] : vector<16x16xf32> to vector<16xf32>
    %40 = vector.shape_cast %39 : vector<16xf32> to vector<16x1xf32>
    %41 = arith.maximumf %38, %40 : vector<16x1xf32>
    %42 = arith.subf %38, %41 : vector<16x1xf32>
    %43 = math.exp %42 : vector<16x1xf32>
    %c0_19 = arith.constant 0 : index
    %c0_20 = arith.constant 0 : index
    %44 = vector.load %arg6[%c0_19, %c0_20] : memref<16x1xf32, #tpu.memory_space<vmem>>, vector<16x1xf32>
    %45 = arith.mulf %44, %43 : vector<16x1xf32>
    %46 = vector.broadcast %41 : vector<16x1xf32> to vector<16x16xf32>
    %47 = arith.subf %18, %46 : vector<16x16xf32>
    %48 = math.exp %47 : vector<16x16xf32>
    %cst_21 = arith.constant dense<0.000000e+00> : vector<16xf32>
    %49 = vector.multi_reduction <add>, %48, %cst_21 [1] : vector<16x16xf32> to vector<16xf32>
    %50 = vector.shape_cast %49 : vector<16xf32> to vector<16x1xf32>
    %51 = arith.addf %45, %50 : vector<16x1xf32>
    %c0_22 = arith.constant 0 : index
    %c0_23 = arith.constant 0 : index
    %52 = vector.load %arg6[%c0_22, %c0_23] : memref<16x1xf32, #tpu.memory_space<vmem>>, vector<16x1xf32>
    tpu.vector_store %arg6[%c0_22, %c0_23], %51 {strides = array<i32>} : memref<16x1xf32, #tpu.memory_space<vmem>>, vector<16x1xf32>,
    %c0_24 = arith.constant 0 : index
    %c0_25 = arith.constant 0 : index
    %53 = vector.load %arg5[%c0_24, %c0_25] : memref<16x1xf32, #tpu.memory_space<vmem>>, vector<16x1xf32>
    tpu.vector_store %arg5[%c0_24, %c0_25], %41 {strides = array<i32>} : memref<16x1xf32, #tpu.memory_space<vmem>>, vector<16x1xf32>,
    %c0_i32_26 = arith.constant 0 : i32
    %54 = arith.cmpi eq, %arg1, %c0_i32_26 : i32
    %55 = arith.extui %54 : i1 to i32
    %c0_i32_27 = arith.constant 0 : i32
    %56 = arith.cmpi ne, %55, %c0_i32_27 : i32
    scf.if %56 {
      %c0_28 = arith.constant 0 : index
      %c0_29 = arith.constant 0 : index
      %57 = vector.load %arg5[%c0_28, %c0_29] : memref<16x1xf32, #tpu.memory_space<vmem>>, vector<16x1xf32>
      %c0_30 = arith.constant 0 : index
      %c0_31 = arith.constant 0 : index
      %58 = vector.load %arg6[%c0_30, %c0_31] : memref<16x1xf32, #tpu.memory_space<vmem>>, vector<16x1xf32>
      %59 = math.log %58 : vector<16x1xf32>
      %60 = arith.addf %57, %59 : vector<16x1xf32>
      %c0_32 = arith.constant 0 : index
      %c0_33 = arith.constant 0 : index
      %61 = vector.load %arg7[%c0_32, %c0_33] : memref<16x1xf32, #tpu.memory_space<vmem>>, vector<16x1xf32>
      %62 = arith.subf %60, %61 : vector<16x1xf32>
      %c0_34 = arith.constant 0 : index
      %c0_35 = arith.constant 0 : index
      %63 = vector.load %arg4[%c0_34, %c0_35] : memref<16x1xf32, #tpu.memory_space<vmem>>, vector<16x1xf32>
      tpu.vector_store %arg4[%c0_34, %c0_35], %62 {strides = array<i32>} : memref<16x1xf32, #tpu.memory_space<vmem>>, vector<16x1xf32>,
    } else {
    }
    return
  }
  func.func @transform_0(%arg0: i32, %arg1: i32) -> (i32, i32) {
    %c0_i32 = arith.constant 0 : i32
    %c0_i32_0 = arith.constant 0 : i32
    return %arg0, %c0_i32 : i32, i32
  }
  func.func @transform_1(%arg0: i32, %arg1: i32) -> (i32, i32) {
    %c0_i32 = arith.constant 0 : i32
    %c0_i32_0 = arith.constant 0 : i32
    return %arg1, %c0_i32 : i32, i32
  }
  func.func @transform_2(%arg0: i32, %arg1: i32) -> (i32, i32) {
    %c0_i32 = arith.constant 0 : i32
    %c0_i32_0 = arith.constant 0 : i32
    return %arg0, %c0_i32 : i32, i32
  }
}

</mosaic_0001>

<bundles_post_ra>
// kernel: tpu_custom_call.1
= control target key start
LH: loop header
LB: loop body
LE: loop exit
PB: predicated region body
PF: predicated region fallthrough
CT: control target
= control target key end

     0   :  { %7 = vsyncpa [#allocation6], 0  ;;  %s418_s0 = inlined_call_operand.hbm [shape: f32[16,32], index: 0, kind: input, shape index: {}]   ;;  %s419_s1 = inlined_call_operand.hbm [shape: f32[16,32], index: 1, kind: input, shape index: {}]   ;;  %s420_s2 = inlined_call_operand.vmem [shape: f32[16,1], index: 2, kind: output, shape index: {}]  }
   0x1   :  { %8 = vsyncpa [#allocation8], 0  ;;  %s357_s9 = smov [#allocation5]  }
   0x2   :  { %s14_s10 = sshll.u32 %s357_s9, 4  ;;  %s15_s10 = int_to_ptr.vmem [resolvable:$true] %s14_s10 }
   0x3   :  { %s321_s11 = scalar_lea.vmem %s15_s10, 256  ;;  %p326_p1 = scmp.lt.s32.totalorder %s15_s10, %s15_s10 }
   0x4   :  { %p322_p0 = scmp.ne.s32.totalorder %s15_s10, %s321_s11  ;;  %p327_p2 = scmp.lt.s32.totalorder %s321_s11, %s321_s11 }
   0x6   :  { %p328_p3 = por %p327_p2, %p326_p1 }
   0x8   :  { %p329_p4 = pnand %p328_p3, %p322_p0 }
   0xa   :  { %332 = shalt.err (!%p329_p4)
}
   0xb   :  { %s358_s12 = smov 128   ;;  %s359_s13 = smov 8  }
   0xc   :  { %20 = dma.hbm_to_vmem [thread:$0]  %s418_s0, 256, %s15_s10, [#allocation6], %s358_s12, %s358_s12, %s359_s13  }
   0xd   :  { %s360_s16 = smov [#allocation7]  }
   0xe   :  { %s26_s17 = sshll.u32 %s360_s16, 4  ;;  %s27_s17 = int_to_ptr.vmem [resolvable:$true] %s26_s17 }
   0xf   :  { %s341_s18 = scalar_lea.vmem %s27_s17, 256  ;;  %p346_p6 = scmp.lt.s32.totalorder %s27_s17, %s27_s17 }
  0x10   :  { %p342_p5 = scmp.ne.s32.totalorder %s27_s17, %s341_s18  ;;  %p347_p7 = scmp.lt.s32.totalorder %s341_s18, %s341_s18 }
  0x12   :  { %p348_p8 = por %p347_p7, %p346_p6 }
  0x14   :  { %p349_p9 = pnand %p348_p8, %p342_p5 }
  0x16   :  { %352 = shalt.err (!%p349_p9)
}
  0x17   :  { %32 = dma.hbm_to_vmem [thread:$0]  %s419_s1, 256, %s27_s17, [#allocation8], %s358_s12, %s358_s12, %s359_s13  }
  0x18   :  { %353 = dma.done.wait [#allocation6], 256  }
  0x19   :  { %354 = vsyncadd [#allocation6], 4294967040 }
  0x1a   :  { %355 = dma.done.wait [#allocation8], 256  }
  0x1b   :  { %356 = vsyncadd [#allocation8], 4294967040  ;;  %vm54_vm0 = vcmask 261120   ;;  %v53_v0 = vld [vmem:[#allocation7 + $0x8] sm:$0xff]  ;;  %v52_v1 = vld [vmem:[#allocation7] sm:$0xff]  ;;  %v143_v4 = vlaneseq  ;;  %vm43_vm5 = vcmask 7168  }
  0x1c   :  { %v50_v2 = vld [vmem:[#allocation5] sm:$0xff]  ;;  %285 = vmatprep.subr.msk.mxu0 %vm54_vm0, %v53_v0  ;;  %v51_v3 = vld [vmem:[#allocation5 + $0x8] sm:$0xff]  ;;  %v361_v11 = vmov -inf   ;;  %vm188_vm8 = vcmask 130048   ;;  %v362_v18 = vmov 0   ;;  %v363_v19 = vmov 0.0  }
  0x1d   :  { %289 = vmatprep.mubr.msk.f32.mxu0 %vm54_vm0, %v50_v2  ;;  %286 = vmatpush3.xpose.msk.msra.mxu0 %vm54_vm0, %v53_v0  ;;  %v144_v5 = vshrl.u32 %v143_v4, 7  ;;  %v151_v7 = vand.u32 127, %v143_v4  ;;  %44 = vst.msk [vmem:[#allocation2] sm:$0xff] %vm43_vm5, %v361_v11  ;;  %45 = vst.msk [vmem:[#allocation2 + $0x8] sm:$0xff] %vm43_vm5, %v361_v11 }
  0x1e   :  { %287 = vmatprep.subr.msk.mxu0 %vm54_vm0, %v52_v1  ;;  %299 = vset.pattern.permute.xlu1 %v362_v18  ;;  %46 = vst.msk [vmem:[#allocation3] sm:$0xff] %vm43_vm5, %v363_v19  ;;  %47 = vst.msk [vmem:[#allocation3 + $0x8] sm:$0xff] %vm43_vm5, %v363_v19 }
  0x1f   :  { %v145_v6 = vadd.s32 8, %v144_v5  ;;  %vm154_vm6 = vcmp.eq.s32.totalorder %v144_v5, %v151_v7  ;;  %300 = vset.pattern.permute.xlu0 %v362_v18  ;;  %48 = vst.msk [vmem:[#allocation4] sm:$0xff] %vm43_vm5, %v363_v19  ;;  %49 = vst.msk [vmem:[#allocation4 + $0x8] sm:$0xff] %vm43_vm5, %v363_v19 }
  0x21   :  { %288 = vmatpush3.xpose.msk.msra.mxu0 %vm54_vm0, %v52_v1  ;;  %v175_v8 = vadd.s32 8, %v145_v6  ;;  %v280_v9 = vadd.s32 4294967288, %v145_v6  ;;  %vm176_vm4 = vcmp.eq.s32.totalorder %v151_v7, %v145_v6  ;;  %vm155_vm7 = vcmp.eq.s32.totalorder %v145_v6, %v151_v7 }
  0x23   :  { %vm177_vm1 = vcmp.eq.s32.totalorder %v151_v7, %v175_v8  ;;  %vm181_vm2 = vcmp.eq.s32.totalorder %v151_v7, %v280_v9 }
  0x24   :  { %290 = vmatmul.mubr.msk.f32.vlgmr.msra.gmra.mxu0 %vm54_vm0, %v51_v3  ;;  %vm385_vm3 = vmor %vm177_vm1, %vm181_vm2  ;;  %v200_v20 = vld [vmem:[#allocation2] sm:$0xff]  ;;  %v201_v23 = vld [vmem:[#allocation2 + $0x8] sm:$0xff] }
  0x25   :  { %v217_v45 = vld [vmem:[#allocation3] sm:$0xff]  ;;  %v218_v49 = vld [vmem:[#allocation3 + $0x8] sm:$0xff] }
  0x26   :  { %v184_v51 = vld [vmem:[#allocation4] sm:$0xff]  ;;  %v185_v57 = vld [vmem:[#allocation4 + $0x8] sm:$0xff] }
  0xe4   :  { %v291_v12 = vpop.f32.mrf.mxu0 }
  0xe5   :  { %v157_v16 = vsel %vm155_vm7, -1e+30, %v291_v12 }
  0xe6   :  { %v133_v13 = vpop.f32.mrf.mxu0  ;;  %v206_v17 = vsel %vm188_vm8, %v157_v16, -inf  ;;  %v187_v40 = vsel %vm385_vm3, %v157_v16, 0.0 }
  0xe7   :  { %v156_v14 = vsel %vm154_vm6, -1e+30, %v133_v13  ;;  %v192_v41 = vsel %vm188_vm8, %v187_v40, 0.0 }
  0xe8   :  { %v203_v15 = vsel %vm188_vm8, %v156_v14, -inf  ;;  %v186_v36 = vsel %vm176_vm4, %v156_v14, 0.0 }
  0xe9   :  { %204 = vmax.xlane.f32.xlu0 %v203_v15  ;;  %v189_v38 = vsel %vm188_vm8, %v186_v36, 0.0 }
  0xed   :  { %207 = vmax.xlane.f32.xlu0 %v206_v17 }
 0x172   :  { %v205_v21 = vpop.xlane.xlu0 %204 }
 0x173   :  { %v209_v22 = vmax.f32 %v200_v20, %v205_v21 }
 0x175   :  { %v211_v24 = vsub.f32 %v200_v20, %v209_v22  ;;  %248 = vst.msk [vmem:[#allocation2] sm:$0xff] %vm43_vm5, %v209_v22  ;;  %223 = vperm.xlu1 %299, %v209_v22  }
 0x176   :  { %v208_v25 = vpop.xlane.xlu0 %207 }
 0x177   :  { %v210_v26 = vmax.f32 %v201_v23, %v208_v25  ;;  %v213_v42 = vmul.f32 1.442695, %v211_v24 }
 0x179   :  { %v212_v27 = vsub.f32 %v201_v23, %v210_v26  ;;  %249 = vst.msk [vmem:[#allocation2 + $0x8] sm:$0xff] %vm43_vm5, %v210_v26  ;;  %228 = vperm.xlu1 %299, %v210_v26  }
 0x17b   :  { %v215_v43 = vmul.f32 1.442695, %v212_v27 }
 0x17c   :  { %v253_v0 = vld [vmem:[#allocation2] sm:$0xff] }
 0x180   :  { %v254_v6 = vld [vmem:[#allocation2 + $0x8] sm:$0xff] }
 0x1f0   :  { %v224_v28 = vpop.permute.xlu1 %223 }
 0x1f1   :  { %v231_v29 = vsub.f32 %v156_v14, %v224_v28 }
 0x1f3   :  { %v233_v30 = vmul.f32 1.442695, %v231_v29 }
 0x1f4   :  { %v229_v31 = vpop.permute.xlu1 %228 }
 0x1f5   :  { %301 = vpow2.f32 %v233_v30  ;;  %v232_v32 = vsub.f32 %v157_v16, %v229_v31 }
 0x1f7   :  { %v235_v33 = vmul.f32 1.442695, %v232_v32 }
 0x1f9   :  { %303 = vpow2.f32 %v235_v33 }
 0x1fa   :  { %305 = vpow2.f32 %v213_v42 }
 0x1fb   :  { %307 = vpow2.f32 %v215_v43 }
 0x202   :  { %v302_v34 = vpop.eup %301 }
 0x203   :  { %v237_v35 = vsel %vm188_vm8, %v302_v34, 0.0 }
 0x204   :  { %238 = vadd.xlane.f32.xlu0 %v237_v35 }
 0x206   :  { %v304_v37 = vpop.eup %303 }
 0x207   :  { %v240_v39 = vsel %vm188_vm8, %v304_v37, 0.0  ;;  %v306_v44 = vpop.eup %305 }
 0x208   :  { %190 = vadd.xlane.f32.xlu0 %v189_v38  ;;  %241 = vadd.xlane.f32.xlu1 %v240_v39  ;;  %v219_v46 = vmul.f32 %v306_v44, %v217_v45  ;;  %v308_v47 = vpop.eup %307 }
 0x209   :  { %v220_v52 = vmul.f32 %v308_v47, %v218_v49 }
 0x20c   :  { %193 = vadd.xlane.f32.xlu0 %v192_v41 }
 0x28d   :  { %v239_v48 = vpop.xlane.xlu0 %238 }
 0x28e   :  { %v243_v50 = vadd.f32 %v239_v48, %v219_v46 }
 0x290   :  { %246 = vst.msk [vmem:[#allocation3] sm:$0xff] %vm43_vm5, %v243_v50 }
 0x291   :  { %v191_v53 = vpop.xlane.xlu0 %190  ;;  %v242_v54 = vpop.xlane.xlu1 %241 }
 0x292   :  { %v195_v55 = vadd.f32 %v191_v53, %v184_v51  ;;  %v244_v56 = vadd.f32 %v242_v54, %v220_v52 }
 0x294   :  { %198 = vst.msk [vmem:[#allocation4] sm:$0xff] %vm43_vm5, %v195_v55  ;;  %247 = vst.msk [vmem:[#allocation3 + $0x8] sm:$0xff] %vm43_vm5, %v244_v56 }
 0x295   :  { %v194_v58 = vpop.xlane.xlu0 %193 }
 0x296   :  { %v196_v59 = vadd.f32 %v194_v58, %v185_v57 }
 0x297   :  { %v255_v60 = vld [vmem:[#allocation3] sm:$0xff] }
 0x298   :  { %309 = vlog2.f32 %v255_v60  ;;  %199 = vst.msk [vmem:[#allocation4 + $0x8] sm:$0xff] %vm43_vm5, %v196_v59 }
 0x29b   :  { %v256_v61 = vld [vmem:[#allocation3 + $0x8] sm:$0xff]  ;;  %v263_v3 = vld [vmem:[#allocation4] sm:$0xff] }
 0x29c   :  { %311 = vlog2.f32 %v256_v61 }
 0x29f   :  { %v264_v8 = vld [vmem:[#allocation4 + $0x8] sm:$0xff] }
 0x2a5   :  { %v310_v62 = vpop.eup %309 }
 0x2a6   :  { %v258_v63 = vmul.f32 0.6931472, %v310_v62 }
 0x2a8   :  { %v261_v1 = vadd.f32 %v258_v63, %v253_v0 }
 0x2a9   :  { %v312_v2 = vpop.eup %311 }
 0x2aa   :  { %v265_v4 = vsub.f32 %v261_v1, %v263_v3  ;;  %v260_v5 = vmul.f32 0.6931472, %v312_v2 }
 0x2ac   :  { %267 = vst.msk [vmem:[%s420_s2] sm:$0xff] %vm43_vm5, %v265_v4  ;;  %v262_v7 = vadd.f32 %v260_v5, %v254_v6 }
 0x2ae   :  { %v266_v9 = vsub.f32 %v262_v7, %v264_v8 }
 0x2b0   :  { %268 = vst.msk [vmem:[%s420_s2 + $0x8] sm:$0xff] %vm43_vm5, %v266_v9 }
 0x2b1   :  { %273 = vsyncpa [#allocation6], 1 }
 0x2b2   :  { %274 = vsyncpa [#allocation8], 1 }

</bundles_post_ra>
